<compile_context>
chip_gen: v7x
topology: tpu7x:2x2x1
jax: 0.10.0
libtpu: 0.0.40
codegen_flags: <defaults>
</compile_context>

<pallas_src>
import functools

import jax
import jax.numpy as jnp
import numpy as np
from jax import lax
from jax.experimental import pallas as pl
from jax.experimental.pallas import tpu as pltpu

INPUT_SIZE = 151
LATENT = 32        # hidden_size of the LSTM
DEC_HIDDEN = 64
OUT_LANES = 256    # decoder output padded to full lane tiles (151 -> 256)


def _ae_lstm_kernel(x_ref, wih_ref, whh_ref, b_ref,
                    w1_ref, b1_ref, w2_ref, b2_ref,
                    out_ref, gates_scr, h_scr, c_scr,
                    *, Tb, B, H, T_total, needs_mask, unroll):
    """One grid step = one time chunk of the LSTM recurrence.

    x_ref     : (Tb*B, I)   time-major chunk (batch padded to a sublane mult.)
    gates_scr : (Tb*B, 4H)  per-chunk precomputed input gates (f32)
    h_scr/c_scr : (B, H)    persistent carries across grid steps
    out_ref   : (B, OUT_LANES)  written only on the last chunk
    """
    chunk = pl.program_id(0)

    # ---- persistent-state init (first chunk only) ------------------------
    @pl.when(chunk == 0)
    def _():
        h_scr[...] = jnp.zeros_like(h_scr)
        c_scr[...] = jnp.zeros_like(c_scr)

    # ---- hoisted input projection for this chunk: one MXU matmul ---------
    #      (bf16 x bf16 -> f32 accumulate) with (b_ih + b_hh) folded in.
    gates_scr[...] = (
        jnp.dot(x_ref[...], wih_ref[...], preferred_element_type=jnp.float32)
        + b_ref[...])

    whh = whh_ref[...]                                  # (H, 4H) hoisted load

    def step(t, carry):
        h, c = carry
        row = pl.multiple_of(t * B, B)                  # B is a multiple of 8
        gates = gates_scr[pl.ds(row, B), :] + jnp.dot(
            h, whh, preferred_element_type=jnp.float32)             # (B, 4H)

        # Single full-(B,4H) sigmoid EUP push; the g gate is recovered via
        # tanh(x) = 2*sigmoid(2x) - 1 (the factor 2 is folded into the
        # g-columns of wih/whh/bias by the wrapper).
        sig = jax.nn.sigmoid(gates)
        i_g = sig[:, 0 * H:1 * H]
        f_g = sig[:, 1 * H:2 * H]
        g_g = 2.0 * sig[:, 2 * H:3 * H] - 1.0
        o_g = sig[:, 3 * H:4 * H]

        c_new = f_g * c + i_g * g_g
        h_new = o_g * jnp.tanh(c_new)

        if needs_mask:
            # Padded timesteps (t_global >= T) are identity updates.
            keep = (chunk * Tb + t < T_total).astype(jnp.float32)
            h_new = keep * h_new + (1.0 - keep) * h
            c_new = keep * c_new + (1.0 - keep) * c
        return (h_new, c_new)

    h, c = lax.fori_loop(0, Tb, step, (h_scr[...], c_scr[...]), unroll=unroll)
    h_scr[...] = h
    c_scr[...] = c

    # ---- decoder (runs once, on the final hidden state) ------------------
    @pl.when(chunk == pl.num_programs(0) - 1)
    def _():
        z = jnp.maximum(
            jnp.dot(h, w1_ref[...], preferred_element_type=jnp.float32)
            + b1_ref[...], 0.0)
        y = (jnp.dot(z, w2_ref[...], preferred_element_type=jnp.float32)
             + b2_ref[...])
        out_ref[...] = jax.nn.sigmoid(y)


def autoencoder_lstm_forward(x, params, *, time_block=32,
                             projection_dtype=jnp.bfloat16):
    """x: (B, T, 151) float32 -> (B, 151) float32."""
    B, T, I = x.shape
    H = params["whh_t"].shape[0]

    B_pad = max(8, ((B + 7) // 8) * 8)
    Tb = max(1, min(time_block, T))
    n_chunks = pl.cdiv(T, Tb)
    T_pad = n_chunks * Tb

    # Fold the tanh(x) = 2*sigmoid(2x) - 1 rewrite into the parameters:
    # scale the g-gate (third quarter) columns of W_ih / W_hh / bias by 2.
    g_scale = jnp.concatenate(
        [jnp.ones((1, 2 * H), jnp.float32),
         jnp.full((1, H), 2.0, jnp.float32),
         jnp.ones((1, H), jnp.float32)], axis=1)
    wih = (params["wih_t"] * g_scale).astype(projection_dtype)
    whh = params["whh_t"] * g_scale
    bias = params["bias"] * g_scale

    # Decoder output lanes padded 151 -> 256 (unmasked store / full N tile).
    w2p = jnp.zeros((DEC_HIDDEN, OUT_LANES), jnp.float32).at[:, :I].set(params["w2_t"])
    b2p = jnp.zeros((1, OUT_LANES), jnp.float32).at[:, :I].set(params["b2"])

    # Time-major (T_pad, B_pad, I) -> flat (T_pad*B_pad, I).  The transpose,
    # padding and bf16 cast fuse into a single XLA pass over x.
    # TODO(synk): avoid this materialisation entirely (see header).
    x_tbi = jnp.transpose(x, (1, 0, 2))
    x_tbi = jnp.pad(x_tbi, ((0, T_pad - T), (0, B_pad - B), (0, 0)))
    x_flat = x_tbi.reshape(T_pad * B_pad, I).astype(projection_dtype)

    kernel = functools.partial(
        _ae_lstm_kernel, Tb=Tb, B=B_pad, H=H, T_total=T,
        needs_mask=(T_pad != T), unroll=min(Tb, 8))

    # VMEM budget: double-buffered x chunk + gate scratch + weights +
    # carries + output block, with margin; clamped into the always-safe
    # [16 MiB (v5e scoped default), 48 MiB (v7x-safe)] window.
    itemsize = jnp.dtype(projection_dtype).itemsize
    chunk_rows = Tb * B_pad
    footprint = (2 * chunk_rows * 256 * itemsize            # x chunk (lane-padded) x2 bufs
                 + chunk_rows * 4 * H * 4                   # gates scratch (f32)
                 + (I * 4 * H) * itemsize                   # wih
                 + (H * 4 * H + 4 * H) * 4                  # whh + bias
                 + (H * DEC_HIDDEN + DEC_HIDDEN
                    + DEC_HIDDEN * OUT_LANES + OUT_LANES) * 4   # decoder weights
                 + 2 * B_pad * H * 4                        # h / c carries
                 + 2 * B_pad * OUT_LANES * 4)               # output block
    vmem_limit = int(min(max(4 * footprint, 16 * 2**20), 48 * 2**20))

    def full(a):
        return pl.BlockSpec(a.shape, lambda t, _nd=a.ndim: (0,) * _nd)

    out = pl.pallas_call(
        kernel,
        out_shape=jax.ShapeDtypeStruct((B_pad, OUT_LANES), jnp.float32),
        grid=(n_chunks,),
        in_specs=[
            pl.BlockSpec((Tb * B_pad, I), lambda t: (t, 0)),   # x time chunk
            full(wih), full(whh), full(bias),
            full(params["w1_t"]), full(params["b1"]), full(w2p), full(b2p),
        ],
        out_specs=pl.BlockSpec((B_pad, OUT_LANES), lambda t: (0, 0)),
        scratch_shapes=[
            pltpu.VMEM((Tb * B_pad, 4 * H), jnp.float32),      # per-chunk gates
            pltpu.VMEM((B_pad, H), jnp.float32),               # h carry
            pltpu.VMEM((B_pad, H), jnp.float32),               # c carry
        ],
        compiler_params=pltpu.CompilerParams(
            dimension_semantics=("arbitrary",),
            vmem_limit_bytes=vmem_limit),
    )(x_flat, wih, whh, bias,
      params["w1_t"], params["b1"], w2p, b2p)

    return out[:B, :I]


def init_params(key, latent=LATENT):
    """Deterministic synthetic params, matching the PyTorch module's shapes."""
    ks = jax.random.split(key, 8)
    k_lstm = 1.0 / np.sqrt(latent)
    k1 = 1.0 / np.sqrt(latent)
    k2 = 1.0 / np.sqrt(DEC_HIDDEN)
    u = lambda k, shape, s: jax.random.uniform(k, shape, jnp.float32, -s, s)
    # PyTorch stores weight_ih (4H, I), weight_hh (4H, H); kept pre-transposed
    # so the kernel does row-major x @ W matmuls.  Gate column order is the
    # PyTorch i, f, g, o stacking.
    wih_t = u(ks[0], (INPUT_SIZE, 4 * latent), k_lstm)
    whh_t = u(ks[1], (latent, 4 * latent), k_lstm)
    bias = u(ks[2], (1, 4 * latent), k_lstm) + u(ks[3], (1, 4 * latent), k_lstm)
    w1_t = u(ks[4], (latent, DEC_HIDDEN), k1)
    b1 = u(ks[5], (1, DEC_HIDDEN), k1)
    w2_t = u(ks[6], (DEC_HIDDEN, INPUT_SIZE), k2)
    b2 = u(ks[7], (1, INPUT_SIZE), k2)
    return dict(wih_t=wih_t, whh_t=whh_t, bias=bias,
                w1_t=w1_t, b1=b1, w2_t=w2_t, b2=b2)


def reference_forward(x, p):
    """Pure-JAX reference mirroring PyTorch LSTM + decoder (all f32)."""
    B, T, I = x.shape
    H = p["whh_t"].shape[0]
    h = jnp.zeros((B, H), jnp.float32)
    c = jnp.zeros((B, H), jnp.float32)

    def step(carry, xt):
        h, c = carry
        gates = xt @ p["wih_t"] + h @ p["whh_t"] + p["bias"]
        i = jax.nn.sigmoid(gates[:, :H])
        f = jax.nn.sigmoid(gates[:, H:2 * H])
        g = jnp.tanh(gates[:, 2 * H:3 * H])
        o = jax.nn.sigmoid(gates[:, 3 * H:])
        c = f * c + i * g
        h = o * jnp.tanh(c)
        return (h, c), None

    (h, c), _ = jax.lax.scan(step, (h, c), jnp.transpose(x, (1, 0, 2)))
    z = jnp.maximum(h @ p["w1_t"] + p["b1"], 0.0)
    return jax.nn.sigmoid(z @ p["w2_t"] + p["b2"])


if __name__ == "__main__":
    key = jax.random.PRNGKey(0)
    kx, kp = jax.random.split(key)
    B, T = 2, 8
    x = jax.random.normal(kx, (B, T, INPUT_SIZE), jnp.float32)
    params = init_params(kp, LATENT)
    ref = jax.block_until_ready(reference_forward(x, params))

    # f32 debug path: tight numerics check (2 time chunks exercised).
    out_f32 = jax.block_until_ready(
        autoencoder_lstm_forward(x, params, time_block=4,
                                 projection_dtype=jnp.float32))
    np.testing.assert_allclose(np.asarray(out_f32), np.asarray(ref),
                               atol=1e-5, rtol=1e-5)

    # Default fast path: bf16 input projection (looser tolerance vs f32 ref).
    out = jax.block_until_ready(autoencoder_lstm_forward(x, params, time_block=4))
    assert out.shape == (B, INPUT_SIZE)
    np.testing.assert_allclose(np.asarray(out), np.asarray(ref),
                               atol=2e-2, rtol=2e-2)

    # Uneven T + odd batch: exercises batch padding and padded-step masking.
    B2, T2 = 3, 10
    x2 = jax.random.normal(jax.random.PRNGKey(1), (B2, T2, INPUT_SIZE), jnp.float32)
    ref2 = jax.block_until_ready(reference_forward(x2, params))
    out2 = jax.block_until_ready(autoencoder_lstm_forward(x2, params, time_block=4))
    np.testing.assert_allclose(np.asarray(out2), np.asarray(ref2),
                               atol=2e-2, rtol=2e-2)

    print("KERNEL_OK")
</pallas_src>

<mosaic_0001>
module attributes {stable_mosaic.version = 11 : i64} {
  func.func @_ae_lstm_kernel(%arg0: i32, %arg1: memref<32x151xf32, #tpu.memory_space<vmem>>, %arg2: memref<151x128xf32, #tpu.memory_space<vmem>>, %arg3: memref<32x128xf32, #tpu.memory_space<vmem>>, %arg4: memref<1x128xf32, #tpu.memory_space<vmem>>, %arg5: memref<32x64xf32, #tpu.memory_space<vmem>>, %arg6: memref<1x64xf32, #tpu.memory_space<vmem>>, %arg7: memref<64x256xf32, #tpu.memory_space<vmem>>, %arg8: memref<1x256xf32, #tpu.memory_space<vmem>>, %arg9: memref<8x256xf32, #tpu.memory_space<vmem>>, %arg10: memref<32x128xf32, #tpu.memory_space<vmem>>, %arg11: memref<8x32xf32, #tpu.memory_space<vmem>>, %arg12: memref<8x32xf32, #tpu.memory_space<vmem>>) attributes {dimension_semantics = [#tpu.dimension_semantics<arbitrary>], iteration_bounds = array<i64: 2>, scalar_prefetch = 0 : i64, scratch_operands = 3 : i64, tpu.core_type = #tpu.core_type<tc>, window_params = [{transform_indices = @transform_0, window_bounds = array<i64: 32, 151>}, {pipeline_mode = #tpu.pipeline_mode<synchronous>, transform_indices = @transform_1, window_bounds = array<i64: 151, 128>}, {pipeline_mode = #tpu.pipeline_mode<synchronous>, transform_indices = @transform_2, window_bounds = array<i64: 32, 128>}, {pipeline_mode = #tpu.pipeline_mode<synchronous>, transform_indices = @transform_3, window_bounds = array<i64: 1, 128>}, {pipeline_mode = #tpu.pipeline_mode<synchronous>, transform_indices = @transform_4, window_bounds = array<i64: 32, 64>}, {pipeline_mode = #tpu.pipeline_mode<synchronous>, transform_indices = @transform_5, window_bounds = array<i64: 1, 64>}, {pipeline_mode = #tpu.pipeline_mode<synchronous>, transform_indices = @transform_6, window_bounds = array<i64: 64, 256>}, {pipeline_mode = #tpu.pipeline_mode<synchronous>, transform_indices = @transform_7, window_bounds = array<i64: 1, 256>}, {pipeline_mode = #tpu.pipeline_mode<synchronous>, transform_indices = @transform_8, window_bounds = array<i64: 8, 256>}]} {
    %c0_i32 = arith.constant 0 : i32
    %0 = arith.cmpi eq, %arg0, %c0_i32 : i32
    %1 = arith.extui %0 : i1 to i32
    %c0_i32_0 = arith.constant 0 : i32
    %2 = arith.cmpi ne, %1, %c0_i32_0 : i32
    scf.if %2 {
      %cst_44 = arith.constant 0.000000e+00 : f32
      %114 = vector.broadcast %cst_44 : f32 to vector<8x32xf32>
      %c0_45 = arith.constant 0 : index
      %c0_46 = arith.constant 0 : index
      %115 = vector.load %arg11[%c0_45, %c0_46] : memref<8x32xf32, #tpu.memory_space<vmem>>, vector<8x32xf32>
      tpu.vector_store %arg11[%c0_45, %c0_46], %114 {strides = array<i32>} : memref<8x32xf32, #tpu.memory_space<vmem>>, vector<8x32xf32>,
      %cst_47 = arith.constant 0.000000e+00 : f32
      %116 = vector.broadcast %cst_47 : f32 to vector<8x32xf32>
      %c0_48 = arith.constant 0 : index
      %c0_49 = arith.constant 0 : index
      %117 = vector.load %arg12[%c0_48, %c0_49] : memref<8x32xf32, #tpu.memory_space<vmem>>, vector<8x32xf32>
      tpu.vector_store %arg12[%c0_48, %c0_49], %116 {strides = array<i32>} : memref<8x32xf32, #tpu.memory_space<vmem>>, vector<8x32xf32>,
    } else {
    }
    %c0 = arith.constant 0 : index
    %c0_1 = arith.constant 0 : index
    %3 = vector.load %arg1[%c0, %c0_1] : memref<32x151xf32, #tpu.memory_space<vmem>>, vector<32x151xf32>
    %c0_2 = arith.constant 0 : index
    %c0_3 = arith.constant 0 : index
    %4 = vector.load %arg2[%c0_2, %c0_3] : memref<151x128xf32, #tpu.memory_space<vmem>>, vector<151x128xf32>
    %cst = arith.constant dense<0.000000e+00> : vector<32x128xf32>
    %5 = tpu.matmul %3, %4, %cst {dimension_numbers = #tpu.dot_dimension_numbers<[1], [0], [0], [1], [0, 0, 1, 1], [], []>} : vector<32x151xf32>, vector<151x128xf32>, vector<32x128xf32> -> vector<32x128xf32>
    %c0_4 = arith.constant 0 : index
    %c0_5 = arith.constant 0 : index
    %6 = vector.load %arg4[%c0_4, %c0_5] : memref<1x128xf32, #tpu.memory_space<vmem>>, vector<1x128xf32>
    %7 = vector.broadcast %6 : vector<1x128xf32> to vector<32x128xf32>
    %8 = arith.addf %5, %7 : vector<32x128xf32>
    %c0_6 = arith.constant 0 : index
    %c0_7 = arith.constant 0 : index
    %9 = vector.load %arg10[%c0_6, %c0_7] : memref<32x128xf32, #tpu.memory_space<vmem>>, vector<32x128xf32>
    tpu.vector_store %arg10[%c0_6, %c0_7], %8 {strides = array<i32>} : memref<32x128xf32, #tpu.memory_space<vmem>>, vector<32x128xf32>,
    %c0_8 = arith.constant 0 : index
    %c0_9 = arith.constant 0 : index
    %10 = vector.load %arg3[%c0_8, %c0_9] : memref<32x128xf32, #tpu.memory_space<vmem>>, vector<32x128xf32>
    %c0_10 = arith.constant 0 : index
    %c0_11 = arith.constant 0 : index
    %11 = vector.load %arg11[%c0_10, %c0_11] : memref<8x32xf32, #tpu.memory_space<vmem>>, vector<8x32xf32>
    %c0_12 = arith.constant 0 : index
    %c0_13 = arith.constant 0 : index
    %12 = vector.load %arg12[%c0_12, %c0_13] : memref<8x32xf32, #tpu.memory_space<vmem>>, vector<8x32xf32>
    %c0_i32_14 = arith.constant 0 : i32
    %c8_i32 = arith.constant 8 : i32
    %13 = arith.muli %c0_i32_14, %c8_i32 : i32
    %14 = tpu.assume_multiple %13, 8 : i32
    %15 = arith.index_cast %14 : i32 to index
    %c0_15 = arith.constant 0 : index
    %16 = vector.load %arg10[%15, %c0_15] : memref<32x128xf32, #tpu.memory_space<vmem>>, vector<8x128xf32>
    %cst_16 = arith.constant dense<0.000000e+00> : vector<8x128xf32>
    %17 = tpu.matmul %11, %10, %cst_16 {dimension_numbers = #tpu.dot_dimension_numbers<[1], [0], [0], [1], [0, 0, 1, 1], [], []>} : vector<8x32xf32>, vector<32x128xf32>, vector<8x128xf32> -> vector<8x128xf32>
    %18 = arith.addf %16, %17 : vector<8x128xf32>
    %19 = arith.negf %18 : vector<8x128xf32>
    %20 = math.exp %19 : vector<8x128xf32>
    %cst_17 = arith.constant 1.000000e+00 : f32
    %21 = vector.broadcast %cst_17 : f32 to vector<8x128xf32>
    %22 = arith.addf %21, %20 : vector<8x128xf32>
    %23 = arith.divf %21, %22 : vector<8x128xf32>
    %24 = vector.extract_strided_slice %23 {offsets = [0, 0], sizes = [8, 32], strides = [1, 1]} : vector<8x128xf32> to vector<8x32xf32>
    %25 = vector.extract_strided_slice %23 {offsets = [0, 32], sizes = [8, 32], strides = [1, 1]} : vector<8x128xf32> to vector<8x32xf32>
    %26 = vector.extract_strided_slice %23 {offsets = [0, 64], sizes = [8, 32], strides = [1, 1]} : vector<8x128xf32> to vector<8x32xf32>
    %cst_18 = arith.constant 2.000000e+00 : f32
    %27 = vector.broadcast %cst_18 : f32 to vector<8x32xf32>
    %28 = arith.mulf %27, %26 : vector<8x32xf32>
    %cst_19 = arith.constant 1.000000e+00 : f32
    %29 = vector.broadcast %cst_19 : f32 to vector<8x32xf32>
    %30 = arith.subf %28, %29 : vector<8x32xf32>
    %31 = vector.extract_strided_slice %23 {offsets = [0, 96], sizes = [8, 32], strides = [1, 1]} : vector<8x128xf32> to vector<8x32xf32>
    %32 = arith.mulf %25, %12 : vector<8x32xf32>
    %33 = arith.mulf %24, %30 : vector<8x32xf32>
    %34 = arith.addf %32, %33 : vector<8x32xf32>
    %35 = math.tanh %34 : vector<8x32xf32>
    %36 = arith.mulf %31, %35 : vector<8x32xf32>
    %c1_i32 = arith.constant 1 : i32
    %c8_i32_20 = arith.constant 8 : i32
    %37 = arith.muli %c1_i32, %c8_i32_20 : i32
    %38 = tpu.assume_multiple %37, 8 : i32
    %39 = arith.index_cast %38 : i32 to index
    %c0_21 = arith.constant 0 : index
    %40 = vector.load %arg10[%39, %c0_21] : memref<32x128xf32, #tpu.memory_space<vmem>>, vector<8x128xf32>
    %cst_22 = arith.constant dense<0.000000e+00> : vector<8x128xf32>
    %41 = tpu.matmul %36, %10, %cst_22 {dimension_numbers = #tpu.dot_dimension_numbers<[1], [0], [0], [1], [0, 0, 1, 1], [], []>} : vector<8x32xf32>, vector<32x128xf32>, vector<8x128xf32> -> vector<8x128xf32>
    %42 = arith.addf %40, %41 : vector<8x128xf32>
    %43 = arith.negf %42 : vector<8x128xf32>
    %44 = math.exp %43 : vector<8x128xf32>
    %cst_23 = arith.constant 1.000000e+00 : f32
    %45 = vector.broadcast %cst_23 : f32 to vector<8x128xf32>
    %46 = arith.addf %45, %44 : vector<8x128xf32>
    %47 = arith.divf %45, %46 : vector<8x128xf32>
    %48 = vector.extract_strided_slice %47 {offsets = [0, 0], sizes = [8, 32], strides = [1, 1]} : vector<8x128xf32> to vector<8x32xf32>
    %49 = vector.extract_strided_slice %47 {offsets = [0, 32], sizes = [8, 32], strides = [1, 1]} : vector<8x128xf32> to vector<8x32xf32>
    %50 = vector.extract_strided_slice %47 {offsets = [0, 64], sizes = [8, 32], strides = [1, 1]} : vector<8x128xf32> to vector<8x32xf32>
    %cst_24 = arith.constant 2.000000e+00 : f32
    %51 = vector.broadcast %cst_24 : f32 to vector<8x32xf32>
    %52 = arith.mulf %51, %50 : vector<8x32xf32>
    %cst_25 = arith.constant 1.000000e+00 : f32
    %53 = vector.broadcast %cst_25 : f32 to vector<8x32xf32>
    %54 = arith.subf %52, %53 : vector<8x32xf32>
    %55 = vector.extract_strided_slice %47 {offsets = [0, 96], sizes = [8, 32], strides = [1, 1]} : vector<8x128xf32> to vector<8x32xf32>
    %56 = arith.mulf %49, %34 : vector<8x32xf32>
    %57 = arith.mulf %48, %54 : vector<8x32xf32>
    %58 = arith.addf %56, %57 : vector<8x32xf32>
    %59 = math.tanh %58 : vector<8x32xf32>
    %60 = arith.mulf %55, %59 : vector<8x32xf32>
    %c2_i32 = arith.constant 2 : i32
    %c8_i32_26 = arith.constant 8 : i32
    %61 = arith.muli %c2_i32, %c8_i32_26 : i32
    %62 = tpu.assume_multiple %61, 8 : i32
    %63 = arith.index_cast %62 : i32 to index
    %c0_27 = arith.constant 0 : index
    %64 = vector.load %arg10[%63, %c0_27] : memref<32x128xf32, #tpu.memory_space<vmem>>, vector<8x128xf32>
    %cst_28 = arith.constant dense<0.000000e+00> : vector<8x128xf32>
    %65 = tpu.matmul %60, %10, %cst_28 {dimension_numbers = #tpu.dot_dimension_numbers<[1], [0], [0], [1], [0, 0, 1, 1], [], []>} : vector<8x32xf32>, vector<32x128xf32>, vector<8x128xf32> -> vector<8x128xf32>
    %66 = arith.addf %64, %65 : vector<8x128xf32>
    %67 = arith.negf %66 : vector<8x128xf32>
    %68 = math.exp %67 : vector<8x128xf32>
    %cst_29 = arith.constant 1.000000e+00 : f32
    %69 = vector.broadcast %cst_29 : f32 to vector<8x128xf32>
    %70 = arith.addf %69, %68 : vector<8x128xf32>
    %71 = arith.divf %69, %70 : vector<8x128xf32>
    %72 = vector.extract_strided_slice %71 {offsets = [0, 0], sizes = [8, 32], strides = [1, 1]} : vector<8x128xf32> to vector<8x32xf32>
    %73 = vector.extract_strided_slice %71 {offsets = [0, 32], sizes = [8, 32], strides = [1, 1]} : vector<8x128xf32> to vector<8x32xf32>
    %74 = vector.extract_strided_slice %71 {offsets = [0, 64], sizes = [8, 32], strides = [1, 1]} : vector<8x128xf32> to vector<8x32xf32>
    %cst_30 = arith.constant 2.000000e+00 : f32
    %75 = vector.broadcast %cst_30 : f32 to vector<8x32xf32>
    %76 = arith.mulf %75, %74 : vector<8x32xf32>
    %cst_31 = arith.constant 1.000000e+00 : f32
    %77 = vector.broadcast %cst_31 : f32 to vector<8x32xf32>
    %78 = arith.subf %76, %77 : vector<8x32xf32>
    %79 = vector.extract_strided_slice %71 {offsets = [0, 96], sizes = [8, 32], strides = [1, 1]} : vector<8x128xf32> to vector<8x32xf32>
    %80 = arith.mulf %73, %58 : vector<8x32xf32>
    %81 = arith.mulf %72, %78 : vector<8x32xf32>
    %82 = arith.addf %80, %81 : vector<8x32xf32>
    %83 = math.tanh %82 : vector<8x32xf32>
    %84 = arith.mulf %79, %83 : vector<8x32xf32>
    %c3_i32 = arith.constant 3 : i32
    %c8_i32_32 = arith.constant 8 : i32
    %85 = arith.muli %c3_i32, %c8_i32_32 : i32
    %86 = tpu.assume_multiple %85, 8 : i32
    %87 = arith.index_cast %86 : i32 to index
    %c0_33 = arith.constant 0 : index
    %88 = vector.load %arg10[%87, %c0_33] : memref<32x128xf32, #tpu.memory_space<vmem>>, vector<8x128xf32>
    %cst_34 = arith.constant dense<0.000000e+00> : vector<8x128xf32>
    %89 = tpu.matmul %84, %10, %cst_34 {dimension_numbers = #tpu.dot_dimension_numbers<[1], [0], [0], [1], [0, 0, 1, 1], [], []>} : vector<8x32xf32>, vector<32x128xf32>, vector<8x128xf32> -> vector<8x128xf32>
    %90 = arith.addf %88, %89 : vector<8x128xf32>
    %91 = arith.negf %90 : vector<8x128xf32>
    %92 = math.exp %91 : vector<8x128xf32>
    %cst_35 = arith.constant 1.000000e+00 : f32
    %93 = vector.broadcast %cst_35 : f32 to vector<8x128xf32>
    %94 = arith.addf %93, %92 : vector<8x128xf32>
    %95 = arith.divf %93, %94 : vector<8x128xf32>
    %96 = vector.extract_strided_slice %95 {offsets = [0, 0], sizes = [8, 32], strides = [1, 1]} : vector<8x128xf32> to vector<8x32xf32>
    %97 = vector.extract_strided_slice %95 {offsets = [0, 32], sizes = [8, 32], strides = [1, 1]} : vector<8x128xf32> to vector<8x32xf32>
    %98 = vector.extract_strided_slice %95 {offsets = [0, 64], sizes = [8, 32], strides = [1, 1]} : vector<8x128xf32> to vector<8x32xf32>
    %cst_36 = arith.constant 2.000000e+00 : f32
    %99 = vector.broadcast %cst_36 : f32 to vector<8x32xf32>
    %100 = arith.mulf %99, %98 : vector<8x32xf32>
    %cst_37 = arith.constant 1.000000e+00 : f32
    %101 = vector.broadcast %cst_37 : f32 to vector<8x32xf32>
    %102 = arith.subf %100, %101 : vector<8x32xf32>
    %103 = vector.extract_strided_slice %95 {offsets = [0, 96], sizes = [8, 32], strides = [1, 1]} : vector<8x128xf32> to vector<8x32xf32>
    %104 = arith.mulf %97, %82 : vector<8x32xf32>
    %105 = arith.mulf %96, %102 : vector<8x32xf32>
    %106 = arith.addf %104, %105 : vector<8x32xf32>
    %107 = math.tanh %106 : vector<8x32xf32>
    %108 = arith.mulf %103, %107 : vector<8x32xf32>
    %c4_i32 = arith.constant 4 : i32
    %c0_38 = arith.constant 0 : index
    %c0_39 = arith.constant 0 : index
    %109 = vector.load %arg11[%c0_38, %c0_39] : memref<8x32xf32, #tpu.memory_space<vmem>>, vector<8x32xf32>
    tpu.vector_store %arg11[%c0_38, %c0_39], %108 {strides = array<i32>} : memref<8x32xf32, #tpu.memory_space<vmem>>, vector<8x32xf32>,
    %c0_40 = arith.constant 0 : index
    %c0_41 = arith.constant 0 : index
    %110 = vector.load %arg12[%c0_40, %c0_41] : memref<8x32xf32, #tpu.memory_space<vmem>>, vector<8x32xf32>
    tpu.vector_store %arg12[%c0_40, %c0_41], %106 {strides = array<i32>} : memref<8x32xf32, #tpu.memory_space<vmem>>, vector<8x32xf32>,
    %c1_i32_42 = arith.constant 1 : i32
    %111 = arith.cmpi eq, %arg0, %c1_i32_42 : i32
    %112 = arith.extui %111 : i1 to i32
    %c0_i32_43 = arith.constant 0 : i32
    %113 = arith.cmpi ne, %112, %c0_i32_43 : i32
    scf.if %113 {
      %c0_44 = arith.constant 0 : index
      %c0_45 = arith.constant 0 : index
      %114 = vector.load %arg5[%c0_44, %c0_45] : memref<32x64xf32, #tpu.memory_space<vmem>>, vector<32x64xf32>
      %cst_46 = arith.constant dense<0.000000e+00> : vector<8x64xf32>
      %115 = tpu.matmul %108, %114, %cst_46 {dimension_numbers = #tpu.dot_dimension_numbers<[1], [0], [0], [1], [0, 0, 1, 1], [], []>} : vector<8x32xf32>, vector<32x64xf32>, vector<8x64xf32> -> vector<8x64xf32>
      %c0_47 = arith.constant 0 : index
      %c0_48 = arith.constant 0 : index
      %116 = vector.load %arg6[%c0_47, %c0_48] : memref<1x64xf32, #tpu.memory_space<vmem>>, vector<1x64xf32>
      %117 = vector.broadcast %116 : vector<1x64xf32> to vector<8x64xf32>
      %118 = arith.addf %115, %117 : vector<8x64xf32>
      %cst_49 = arith.constant 0.000000e+00 : f32
      %119 = vector.broadcast %cst_49 : f32 to vector<8x64xf32>
      %120 = arith.maximumf %118, %119 : vector<8x64xf32>
      %c0_50 = arith.constant 0 : index
      %c0_51 = arith.constant 0 : index
      %121 = vector.load %arg7[%c0_50, %c0_51] : memref<64x256xf32, #tpu.memory_space<vmem>>, vector<64x256xf32>
      %cst_52 = arith.constant dense<0.000000e+00> : vector<8x256xf32>
      %122 = tpu.matmul %120, %121, %cst_52 {dimension_numbers = #tpu.dot_dimension_numbers<[1], [0], [0], [1], [0, 0, 1, 1], [], []>} : vector<8x64xf32>, vector<64x256xf32>, vector<8x256xf32> -> vector<8x256xf32>
      %c0_53 = arith.constant 0 : index
      %c0_54 = arith.constant 0 : index
      %123 = vector.load %arg8[%c0_53, %c0_54] : memref<1x256xf32, #tpu.memory_space<vmem>>, vector<1x256xf32>
      %124 = vector.broadcast %123 : vector<1x256xf32> to vector<8x256xf32>
      %125 = arith.addf %122, %124 : vector<8x256xf32>
      %126 = arith.negf %125 : vector<8x256xf32>
      %127 = math.exp %126 : vector<8x256xf32>
      %cst_55 = arith.constant 1.000000e+00 : f32
      %128 = vector.broadcast %cst_55 : f32 to vector<8x256xf32>
      %129 = arith.addf %128, %127 : vector<8x256xf32>
      %130 = arith.divf %128, %129 : vector<8x256xf32>
      %c0_56 = arith.constant 0 : index
      %c0_57 = arith.constant 0 : index
      %131 = vector.load %arg9[%c0_56, %c0_57] : memref<8x256xf32, #tpu.memory_space<vmem>>, vector<8x256xf32>
      tpu.vector_store %arg9[%c0_56, %c0_57], %130 {strides = array<i32>} : memref<8x256xf32, #tpu.memory_space<vmem>>, vector<8x256xf32>,
    } else {
    }
    return
  }
  func.func @transform_0(%arg0: i32) -> (i32, i32) {
    %c0_i32 = arith.constant 0 : i32
    %c0_i32_0 = arith.constant 0 : i32
    return %arg0, %c0_i32 : i32, i32
  }
  func.func @transform_1(%arg0: i32) -> (i32, i32) {
    %c0_i32 = arith.constant 0 : i32
    %c0_i32_0 = arith.constant 0 : i32
    %c0_i32_1 = arith.constant 0 : i32
    return %c0_i32, %c0_i32_0 : i32, i32
  }
  func.func @transform_2(%arg0: i32) -> (i32, i32) {
    %c0_i32 = arith.constant 0 : i32
    %c0_i32_0 = arith.constant 0 : i32
    %c0_i32_1 = arith.constant 0 : i32
    return %c0_i32, %c0_i32_0 : i32, i32
  }
  func.func @transform_3(%arg0: i32) -> (i32, i32) {
    %c0_i32 = arith.constant 0 : i32
    %c0_i32_0 = arith.constant 0 : i32
    %c0_i32_1 = arith.constant 0 : i32
    return %c0_i32, %c0_i32_0 : i32, i32
  }
  func.func @transform_4(%arg0: i32) -> (i32, i32) {
    %c0_i32 = arith.constant 0 : i32
    %c0_i32_0 = arith.constant 0 : i32
    %c0_i32_1 = arith.constant 0 : i32
    return %c0_i32, %c0_i32_0 : i32, i32
  }
  func.func @transform_5(%arg0: i32) -> (i32, i32) {
    %c0_i32 = arith.constant 0 : i32
    %c0_i32_0 = arith.constant 0 : i32
    %c0_i32_1 = arith.constant 0 : i32
    return %c0_i32, %c0_i32_0 : i32, i32
  }
  func.func @transform_6(%arg0: i32) -> (i32, i32) {
    %c0_i32 = arith.constant 0 : i32
    %c0_i32_0 = arith.constant 0 : i32
    %c0_i32_1 = arith.constant 0 : i32
    return %c0_i32, %c0_i32_0 : i32, i32
  }
  func.func @transform_7(%arg0: i32) -> (i32, i32) {
    %c0_i32 = arith.constant 0 : i32
    %c0_i32_0 = arith.constant 0 : i32
    %c0_i32_1 = arith.constant 0 : i32
    return %c0_i32, %c0_i32_0 : i32, i32
  }
  func.func @transform_8(%arg0: i32) -> (i32, i32) {
    %c0_i32 = arith.constant 0 : i32
    %c0_i32_0 = arith.constant 0 : i32
    %c0_i32_1 = arith.constant 0 : i32
    return %c0_i32, %c0_i32_0 : i32, i32
  }
}

</mosaic_0001>

<bundles_post_ra>
// kernel: tpu_custom_call.1
= control target key start
LH: loop header
LB: loop body
LE: loop exit
PB: predicated region body
PF: predicated region fallthrough
CT: control target
= control target key end

     0   :  { %13 = vsyncpa [#allocation6], 0  ;;  %s2225_s0 = inlined_call_operand.hbm [shape: f32[64,151], index: 0, kind: input, shape index: {}]   ;;  %s2226_s1 = inlined_call_operand.hbm [shape: f32[151,128], index: 1, kind: input, shape index: {}]   ;;  %s2227_s2 = inlined_call_operand.hbm [shape: f32[32,128], index: 2, kind: input, shape index: {}]   ;;  %s2228_s3 = inlined_call_operand.vmem [shape: f32[1,128], index: 3, kind: input, shape index: {}]   ;;  %s2229_s4 = inlined_call_operand.hbm [shape: f32[32,64], index: 4, kind: input, shape index: {}]   ;;  %s2230_s5 = inlined_call_operand.vmem [shape: f32[1,64], index: 5, kind: input, shape index: {}]   ;;  %s2231_s6 = inlined_call_operand.hbm [shape: f32[64,256], index: 6, kind: input, shape index: {}]   ;;  %s2232_s7 = inlined_call_operand.vmem [shape: f32[1,256], index: 7, kind: input, shape index: {}]   ;;  %s2233_s8 = inlined_call_operand.hbm [shape: f32[8,256], index: 8, kind: output, shape index: {}]  }
   0x1   :  { %15 = vsyncpa [#allocation6 + $0x1], 0 }
   0x2   :  { %16 = vsyncpa [#allocation9], 0 }
   0x3   :  { %17 = vsyncpa [#allocation12], 0 }
   0x4   :  { %18 = vsyncpa [#allocation7], 0  ;;  %s1872_s27 = smov 0   ;;  %s1874_s28 = smov 0  }
   0x5   :  { %s1876_s29 = smov 0   ;;  %s1878_s30 = smov 0  }
   0x6 LB: > { %s1891_s9 = sadd.s32 4294967295, %s1805_s30   ;;  %p44_p0 = scmp.ne.s32.totalorder %s1797_s28, %s1793_s27  ;;  %s1805_s30 = sphi %s1878_s30, %s2252_s30   ;;  %s1801_s29 = sphi %s1876_s29, %s2251_s29   ;;  %s1797_s28 = sphi %s1874_s28, %s2250_s28   ;;  %s1793_s27 = sphi %s1872_s27, %s2249_s27  }
   0x7   : > { %p2234_p1 = scmp.eq.s32.totalorder %s1891_s9, 0  ;;  %p1250_p2 = scmp.ge.s32.totalorder %s1805_s30, 1 }
   0x8   : > { %p223_p3 = scmp.lt.s32.totalorder %s1805_s30, 3  ;;  %s1807_s12 = smov [#allocation8]  }
   0x9   : > { %p1900_p5 = por %p2234_p1, %p44_p0  ;;  %s235_s13 = sshll.u32 %s1807_s12, 4  ;;  %s1908_s13 = int_to_ptr.vmem [resolvable:$true] %s235_s13 }
   0xa   : > { %p1904_p6 = pnand %p1250_p2, %p223_p3  ;;  %s1808_s15 = smov [#allocation11]  }
   0xb   : > { %s2237_s10 = scalar_select %p1900_p5, 1, 0 }
   0xc   : > { %s2238_s11 = scalar_select %p1904_p6, 1, 0 }
   0xd   : > { %p1480_p7 = pneg %p1904_p6  ;;  %s264_s16 = sshll.u32 %s1808_s15, 4  ;;  %s1918_s16 = int_to_ptr.vmem [resolvable:$true] %s264_s16 }
   0xe   : > { %s1809_s17 = smov [#allocation10]   ;;  %s1591_s21 = scalar_lea.hbm %s2226_s1, 2432 }
   0xf   : > { %p1914_p8 = pnand %p1480_p7, %p2234_p1  ;;  %s1920_s18 = sshll.u32 %s1809_s17, 4  ;;  %s249_s18 = int_to_ptr.vmem [resolvable:$true] %s1920_s18 }
  0x10   : > { %p1592_p9 = scmp.ne.s32.totalorder %s2226_s1, %s1591_s21  ;;  %p1598_p13 = scmp.lt.u32.totalorder %s1591_s21, %s2226_s1 }
  0x11   : > { %p1930_p10 = pneg %p1914_p8 }
  0x13   : > { %p1594_p11 = pnand %p1930_p10, %p1592_p9 }
  0x15   : > { %p1595_p12 = pneg %p1594_p11 }
  0x17   : > { %p1600_p0 = pnand %p1598_p13, %p1595_p12 }
  0x19   : > { %1603 = shalt.err (!%p1600_p0)
}
  0x1a   : > { %s1604_s27 = scalar_lea.vmem %s1908_s13, 2432  ;;  %p1612_p4 = scmp.lt.s32.totalorder %s1908_s13, %s1908_s13 }
  0x1b   : > { %p1605_p2 = scmp.ne.s32.totalorder %s1908_s13, %s1604_s27  ;;  %p1613_p1 = scmp.lt.s32.totalorder %s1604_s27, %s1604_s27 }
  0x1d   : > { %p1607_p3 = pnand %p1605_p2, %p1930_p10  ;;  %p1614_p9 = por %p1613_p1, %p1612_p4 }
  0x1f   : > { %p1608_p7 = pneg %p1607_p3 }
  0x21   : > { %p1615_p11 = pnand %p1614_p9, %p1608_p7 }
  0x23   : > { %1618 = shalt.err (!%p1615_p11)
}
  0x24   : > { %s1810_s12 = smov 128   ;;  %s1811_s15 = smov 8  }
  0x25   : > { %1483 = dma.hbm_to_vmem [thread:$0]  (!%p1914_p8), %s2226_s1, 2432, %s1908_s13, [#allocation9], %s1810_s12, %s1810_s12, %s1811_s15  }
  0x26   : > { %s1619_s22 = scalar_lea.hbm %s2229_s4, 512 }
  0x27   : > { %p1620_p1 = scmp.ne.s32.totalorder %s2229_s4, %s1619_s22  ;;  %p1626_p13 = scmp.lt.u32.totalorder %s1619_s22, %s2229_s4 }
  0x29   : > { %p1622_p4 = pnand %p1620_p1, %p1930_p10 }
  0x2b   : > { %p1623_p12 = pneg %p1622_p4 }
  0x2d   : > { %p1628_p0 = pnand %p1626_p13, %p1623_p12 }
  0x2f   : > { %1631 = shalt.err (!%p1628_p0)
}
  0x30   : > { %s1632_s13 = scalar_lea.vmem %s1918_s16, 512  ;;  %p1640_p9 = scmp.lt.s32.totalorder %s1918_s16, %s1918_s16 }
  0x31   : > { %p1633_p2 = scmp.ne.s32.totalorder %s1918_s16, %s1632_s13  ;;  %p1641_p11 = scmp.lt.s32.totalorder %s1632_s13, %s1632_s13 }
  0x33   : > { %p1635_p3 = pnand %p1633_p2, %p1930_p10  ;;  %p1642_p1 = por %p1641_p11, %p1640_p9 }
  0x35   : > { %p1636_p7 = pneg %p1635_p3 }
  0x37   : > { %p1643_p4 = pnand %p1642_p1, %p1636_p7 }
  0x39   : > { %1646 = shalt.err (!%p1643_p4)
}
  0x3a   : > { %1489 = dma.hbm_to_vmem [thread:$0]  (!%p1914_p8), %s2229_s4, 512, %s1918_s16, [#allocation12], %s1810_s12, %s1810_s12, %s1811_s15  }
  0x3b   : > { %s1647_s22 = scalar_lea.hbm %s2227_s2, 512 }
  0x3c   : > { %p1648_p12 = scmp.ne.s32.totalorder %s2227_s2, %s1647_s22  ;;  %p1654_p2 = scmp.lt.u32.totalorder %s1647_s22, %s2227_s2 }
  0x3e   : > { %p1650_p13 = pnand %p1648_p12, %p1930_p10 }
  0x40   : > { %p1651_p0 = pneg %p1650_p13 }
  0x42   : > { %p1656_p3 = pnand %p1654_p2, %p1651_p0 }
  0x44   : > { %1659 = shalt.err (!%p1656_p3)
}
  0x45   : > { %s1660_s13 = scalar_lea.vmem %s249_s18, 512  ;;  %p1668_p1 = scmp.lt.s32.totalorder %s249_s18, %s249_s18 }
  0x46   : > { %p1661_p7 = scmp.ne.s32.totalorder %s249_s18, %s1660_s13  ;;  %p1669_p4 = scmp.lt.s32.totalorder %s1660_s13, %s1660_s13 }
  0x48   : > { %p1663_p9 = pnand %p1661_p7, %p1930_p10  ;;  %p1670_p5 = por %p1669_p4, %p1668_p1 }
  0x4a   : > { %p1664_p11 = pneg %p1663_p9 }
  0x4c   : > { %p1671_p6 = pnand %p1670_p5, %p1664_p11 }
  0x4e   : > { %1674 = shalt.err (!%p1671_p6)
}
  0x4f   : > { %1486 = dma.hbm_to_vmem [thread:$0]  (!%p1914_p8), %s2227_s2, 512, %s249_s18, [#allocation9], %s1810_s12, %s1810_s12, %s1811_s15  }
  0x50   : > { %s1812_s19 = smov [#allocation13]   ;;  %s1675_s23 = scalar_lea.hbm %s2231_s6, 2048 }
  0x51   : > { %s280_s20 = sshll.u32 %s1812_s19, 4  ;;  %p1676_p5 = scmp.ne.s32.totalorder %s2231_s6, %s1675_s23  ;;  %s281_s20 = int_to_ptr.vmem [resolvable:$true] %s280_s20 }
  0x52   : > { %p1682_p13 = scmp.lt.u32.totalorder %s1675_s23, %s2231_s6 }
  0x53   : > { %p1678_p6 = pnand %p1676_p5, %p1930_p10 }
  0x55   : > { %p1679_p12 = pneg %p1678_p6 }
  0x57   : > { %p1684_p0 = pnand %p1682_p13, %p1679_p12 }
  0x59   : > { %1687 = shalt.err (!%p1684_p0)
}
  0x5a   : > { %s1688_s18 = scalar_lea.vmem %s281_s20, 2048  ;;  %p1696_p9 = scmp.lt.s32.totalorder %s281_s20, %s281_s20 }
  0x5b   : > { %p1689_p2 = scmp.ne.s32.totalorder %s281_s20, %s1688_s18  ;;  %p1697_p11 = scmp.lt.s32.totalorder %s1688_s18, %s1688_s18 }
  0x5d   : > { %p1691_p3 = pnand %p1689_p2, %p1930_p10  ;;  %p1698_p1 = por %p1697_p11, %p1696_p9 }
  0x5f   : > { %p1692_p7 = pneg %p1691_p3 }
  0x61   : > { %p1699_p4 = pnand %p1698_p1, %p1692_p7 }
  0x63   : > { %1702 = shalt.err (!%p1699_p4)
}
  0x64   : > { %s1813_s12 = smov 256   ;;  %s1814_s24 = smov 16  }
  0x65   : > { %1492 = dma.hbm_to_vmem [thread:$0]  (!%p1914_p8), %s2231_s6, 2048, %s281_s20, [#allocation12], %s1813_s12, %s1813_s12, %s1814_s24  }
  0x66   : > { %s2024_s17 = sadd.s32 1, %s1805_s30   ;;  %s31_s21 = sadd.s32 1, %s1801_s29 }
  0x67   : > { %s28_s19 = ssub.s32 %s1805_s30, %s2024_s17  ;;  %p38_p5 = scmp.ne.s32.totalorder %s1801_s29, %s1797_s28 }
  0x68   : > { %p29_p10 = scmp.eq.s32.totalorder %s28_s19, 0  ;;  %p39_p6 = scmp.eq.s32.totalorder %s1805_s30, 0 }
  0x69   : > { %p1501_p13 = scmp.lt.s32.totalorder %s1805_s30, 2  ;;  %s297_s14 = sand.u32 1, %s1801_s29  }
  0x6a   : > { %s2033_s22 = scalar_select %p29_p10, %s1801_s29, %s31_s21  }
  0x6b   : > { %p40_p12 = por %p39_p6, %p38_p5  ;;  %s1296_s23 = sshll.u32 %s1805_s30, 10 }
  0x6c   : > { %s1256_s25 = sshll.u32 %s297_s14, 6  ;;  %s2041_s13 = scalar_lea.hbm %s2225_s0, %s1296_s23 }
  0x6d   : > { %s301_s20 = scalar_lea.vmem [#allocation5], %s1256_s25  ;;  %p2043_p8 = pnand %p1501_p13, %p40_p12 }
  0x6e   : > { %s309_s18 = sshll.u32 %s301_s20, 4  ;;  %s2049_s30 = scalar_lea.sflag [#allocation6], %s297_s14  ;;  %s2047_s18 = int_to_ptr.vmem [resolvable:$true] %s309_s18 }
  0x6f   : > { %s1703_s16 = scalar_lea.hbm %s2041_s13, 1024  ;;  %p1705_p2 = pneg %p2043_p8 }
  0x70   : > { %p1704_p0 = scmp.ne.s32.totalorder %s2041_s13, %s1703_s16  ;;  %s1708_s23 = scalar_lea.hbm %s2225_s0, 2048 }
  0x71   : > { %p1709_p9 = scmp.lt.u32.totalorder %s2041_s13, %s2225_s0  ;;  %p1710_p11 = scmp.lt.u32.totalorder %s1708_s23, %s1703_s16 }
  0x72   : > { %p1706_p3 = pnand %p1705_p2, %p1704_p0  ;;  %p1712_p4 = scmp.lt.u32.totalorder %s1703_s16, %s2041_s13 }
  0x73   : > { %p1711_p1 = por %p1710_p11, %p1709_p9 }
  0x74   : > { %p1707_p7 = pneg %p1706_p3 }
  0x75   : > { %p1713_p10 = por %p1712_p4, %p1711_p1 }
  0x77   : > { %p1714_p5 = pnand %p1713_p10, %p1707_p7 }
  0x79   : > { %1717 = shalt.err (!%p1714_p5)
}
  0x7a   : > { %s1718_s14 = scalar_lea.vmem %s2047_s18, 1024  ;;  %s1815_s27 = smov [#allocation5]  }
  0x7b   : > { %p1719_p6 = scmp.ne.s32.totalorder %s2047_s18, %s1718_s14  ;;  %s1723_s20 = sshll.u32 %s1815_s27, 4  ;;  %s1724_s20 = int_to_ptr.vmem [resolvable:$false] %s1723_s20 }
  0x7c   : > { %s1725_s19 = scalar_lea.vmem %s1724_s20, 2048  ;;  %p1726_p0 = scmp.lt.s32.totalorder %s2047_s18, %s1724_s20 }
  0x7d   : > { %p1721_p12 = pnand %p1719_p6, %p1705_p2  ;;  %p1727_p3 = scmp.lt.s32.totalorder %s1725_s19, %s1718_s14 }
  0x7f   : > { %p1722_p13 = pneg %p1721_p12  ;;  %p1728_p9 = por %p1727_p3, %p1726_p0 }
  0x81   : > { %p1729_p11 = pnand %p1728_p9, %p1722_p13 }
  0x83   : > { %1732 = shalt.err (!%p1729_p11)
}
  0x84   : > { %1496 = dma.hbm_to_vmem [thread:$0]  (!%p2043_p8), %s2041_s13, 1024, %s2047_s18, %s2049_s30, %s1813_s12, %s1813_s12, %s1814_s24  }
  0x85   : > { %p2242_p2 = scmp.ne.s32.totalorder %s2238_s11, 0 }
  0x86   : > { %s323_s16 = sand.u32 (!%p2242_p2), 1, %s1797_s28   ;;  %p2243_p7 = scmp.ne.s32.totalorder (!%p2242_p2), %s2237_s10, 0 }
  0x87   : > { %321 = sbr.rel (%p2242_p2) target bundleno = 3567 (0xdef), region = 52  ;;  %s1261_s21 = sshll.u32 (!%p2242_p2), %s323_s16, 6 }
  0x88   : > { %s324_s23 = scalar_lea.sflag (!%p2242_p2), [#allocation6], %s323_s16  ;;  %s2083_s25 = scalar_lea.vmem (!%p2242_p2), [#allocation5], %s1261_s21 }
  0x8e   : > { %1776 = dma.done.wait (%p2243_p7), %s324_s23, 1024  }
  0x8f   : > { %1778 = vsyncadd (%p2243_p7), %s324_s23, 4294966272  ;;  %p2244_p1 = scmp.eq.s32.totalorder %s1891_s9, 0 }
  0x91   : > { %1780 = dma.done.wait (%p2244_p1), [#allocation9], 2944   ;;  %p2245_p8 = pmov %p2244_p1 }
  0x92   : > { %p2246_p4 = pmov %p2244_p1 }
  0x93   : > { %1782 = vsyncadd (%p2245_p8), [#allocation9], 4294964352 }
  0x94   : > { %1784 = dma.done.wait (%p2246_p4), [#allocation12], 2560   ;;  %p2247_p10 = pmov %p2244_p1 }
  0x95   : > { %p2248_p5 = scmp.ne.s32.totalorder %s1891_s9, 0 }
  0x96   : > { %1786 = vsyncadd (%p2247_p10), [#allocation12], 4294964736  ;;  %vm376_vm0 = vcmask (!%p2248_p5), 261120   ;;  %v1816_v0 = vmov (!%p2248_p5), 0.0  }
  0x97   : > { %375 = sbr.rel (%p2248_p5) target bundleno = 158 (0x9e), region = 76  ;;  %377 = vst.msk [vmem:[#allocation3] sm:$0xff] (!%p2248_p5), %vm376_vm0, %v1816_v0  ;;  %378 = vst.msk [vmem:[#allocation4] sm:$0xff] (!%p2248_p5), %vm376_vm0, %v1816_v0 }
  0x9e PF: > { %v387_v1 = vld [vmem:[#allocation8] sm:$0xff]  ;;  %v388_v2 = vld [vmem:[#allocation8 + $0x8] sm:$0xff]  ;;  %v389_v3 = vld [vmem:[#allocation8 + $0x10] sm:$0xff]  ;;  %v1817_v4 = vmov 0.0|0.0   ;;  %vm1818_vm1 = vmmov 0   ;;  %v1819_v7 = vmov 0.0  }
  0x9f   : > { %1377 = vmatprep.subr.bf16.mxu1 %v1817_v4  ;;  %v1378_v5 = vpack.c.bf16 %v388_v2, %v387_v1  ;;  %v390_v6 = vld [vmem:[#allocation8 + $0x18] sm:$0xff]  ;;  %1404 = vmatprep.subr.bf16.mxu0 %v1817_v4  ;;  %v391_v9 = vld [vmem:[#allocation8 + $0x20] sm:$0xff]  ;;  %v392_v10 = vld [vmem:[#allocation8 + $0x28] sm:$0xff]  ;;  %vm413_vm2 = vcmask 187392   ;;  %vm526_vm3 = vcmask 261120   ;;  %vm426_vm4 = vcmask 1046528  }
  0xa0   : > { %1330 = vmatprep.mubr.msk.f32.mxu0 %vm1818_vm1, %v1819_v7  ;;  %v1381_v8 = vpack.c.bf16 %v390_v6, %v389_v3  ;;  %v519_v11 = vld [vmem:[#allocation10] sm:$0xff]  ;;  %v520_v12 = vld [vmem:[#allocation10 + $0x8] sm:$0xff]  ;;  %v521_v14 = vld [vmem:[#allocation10 + $0x10] sm:$0xff]  ;;  %v1384_v15 = vpack.c.bf16 %v392_v10, %v391_v9  ;;  %s1820_s12 = smov 64   ;;  %s1821_s24 = smov 32  }
  0xa1   : > { %1379 = vmatpush1.bf16.msra.mxu1 %v1378_v5  ;;  %v2104_v13 = vpack.c.bf16 %v520_v12, %v519_v11  ;;  %v522_v16 = vld [vmem:[#allocation10 + $0x18] sm:$0xff]  ;;  %v380_v17 = vld [vmem:[%s2083_s25 + $0x8] sm:$0xff]  ;;  %v394_v19 = vld [vmem:[#allocation8 + $0x38] sm:$0xff]  ;;  %s1822_s13 = smov 96   ;;  %p1285_p6 = scmp.ne.s32.totalorder %s1891_s9, 1 }
  0xa2   : > { %1380 = vmatprep.subr.bf16.mxu1 %v1817_v4  ;;  %v393_v18 = vld [vmem:[#allocation8 + $0x30] sm:$0xff]  ;;  %v2109_v20 = vpack.c.bf16 %v522_v16, %v521_v14  ;;  %1269 = vmatprep.mubr.msk.f32.mxu1 %vm413_vm2, %v380_v17  ;;  %v395_v22 = vld [vmem:[#allocation8 + $0x40] sm:$0xff]  ;;  %v396_v23 = vld [vmem:[#allocation8 + $0x48] sm:$0xff]  ;;  %vm1824_vm5 = vmmov (!%p1285_p6), 0   ;;  %vm1065_vm6 = vcmask (!%p1285_p6), 523264  }
  0xa3   : > { %1406 = vmatpush3.bf16.msra.mxu0 %v2104_v13  ;;  %v1387_v21 = vpack.c.bf16 %v394_v19, %v393_v18  ;;  %v523_v24 = vld [vmem:[#allocation3] sm:$0xff]  ;;  %v1390_v25 = vpack.c.bf16 %v396_v23, %v395_v22  ;;  %v398_v27 = vld [vmem:[#allocation8 + $0x58] sm:$0xff]  ;;  %v399_v29 = vld [vmem:[#allocation8 + $0x60] sm:$0xff] }
  0xa4   : > { %1407 = vmatprep.subr.bf16.mxu0 %v1817_v4  ;;  %v397_v26 = vld [vmem:[#allocation8 + $0x50] sm:$0xff]  ;;  %v400_v30 = vld [vmem:[#allocation8 + $0x68] sm:$0xff]  ;;  %v402_v33 = vld [vmem:[#allocation8 + $0x78] sm:$0xff] }
  0xa5   : > { %1382 = vmatpush1.bf16.msra.mxu1 %v1381_v8  ;;  %v1393_v28 = vpack.c.bf16 %v398_v27, %v397_v26  ;;  %v1396_v31 = vpack.c.bf16 %v400_v30, %v399_v29  ;;  %v401_v32 = vld [vmem:[#allocation8 + $0x70] sm:$0xff]  ;;  %v403_v35 = vld [vmem:[#allocation8 + $0x80] sm:$0xff]  ;;  %v404_v36 = vld [vmem:[#allocation8 + $0x88] sm:$0xff] }
  0xa6   : > { %1383 = vmatprep.subr.bf16.mxu1 %v1817_v4  ;;  %v1399_v34 = vpack.c.bf16 %v402_v33, %v401_v32  ;;  %v1402_v37 = vpack.c.bf16 %v404_v36, %v403_v35  ;;  %v405_v38 = vld [vmem:[#allocation8 + $0x90] sm:$0x7f]  ;;  %v379_v39 = vld [vmem:[%s2083_s25] sm:$0xff]  ;;  %v524_v53 = vld [vmem:[#allocation4] sm:$0xff] }
  0xa7   : > { %1409 = vmatpush3.bf16.msra.mxu0 %v2109_v20  ;;  %v2133_v42 = vld [vmem:[%s2228_s3] ss:$0 sm:$0xff]  ;;  %v382_v60 = vld [vmem:[%s2083_s25 + $0x18] sm:$0xff]  ;;  %v384_v23 = vld [vmem:[%s2083_s25 + $0x28] sm:$0xff] }
  0xa8   : > { %1410 = vmatprep.subr.bf16.mxu0 %v1817_v4  ;;  %v381_v61 = vld [vmem:[%s2083_s25 + $0x10] sm:$0xff] }
  0xa9   : > { %1385 = vmatpush1.bf16.msra.mxu1 %v1384_v15 }
  0xaa   : > { %1386 = vmatprep.subr.bf16.mxu1 %v1817_v4  ;;  %1331 = vmatmul.mubr.msk.f32.vlgmr.msra.gmra.mrb[0].mxu0 %vm526_vm3, %v523_v24  ;;  %v383_v24 = vld [vmem:[%s2083_s25 + $0x20] sm:$0xff] }
  0xab   : > { %1412 = vmatpush3.bf16.msra.mxu0 %v2104_v13  ;;  %1341 = vmatprep.mubr.msk.f32.mxu0 %vm1818_vm1, %v1819_v7 }
  0xac   : > { %1413 = vmatprep.subr.bf16.mxu0 %v1817_v4 }
  0xad   : > { %1388 = vmatpush1.bf16.msra.mxu1 %v1387_v21 }
  0xae   : > { %1389 = vmatprep.subr.bf16.mxu1 %v1817_v4 }
  0xaf   : > { %1415 = vmatpush3.bf16.msra.mxu0 %v2109_v20 }
  0xb0   : > { %1416 = vmatprep.subr.bf16.mxu0 %v1817_v4 }
  0xb1   : > { %1391 = vmatpush1.bf16.msra.mxu1 %v1390_v25 }
  0xb2   : > { %1392 = vmatprep.subr.bf16.mxu1 %v1817_v4 }
  0xb5   : > { %1394 = vmatpush1.bf16.msra.mxu1 %v1393_v28 }
  0xb6   : > { %1395 = vmatprep.subr.bf16.mxu1 %v1817_v4 }
  0xb9   : > { %1397 = vmatpush1.bf16.msra.mxu1 %v1396_v31 }
  0xba   : > { %1398 = vmatprep.subr.bf16.mxu1 %v1817_v4 }
  0xbd   : > { %1400 = vmatpush1.bf16.msra.mxu1 %v1399_v34 }
  0xbe   : > { %1401 = vmatprep.subr.bf16.mxu1 %v1817_v4 }
  0xc1   : > { %1403 = vmatpush1.bf16.msra.mxu1 %v1402_v37 }
  0xc2   : > { %466 = vmatprep.subr.mxu1 %v1819_v7 }
  0xc5   : > { %1268 = vmatpush1.msk.msra.mxu1 %vm426_vm4, %v405_v38 }
  0xc6   : > { %495 = vmatmul.mubr.f32.vlgmr.msra.gmra.mrb[0].mxu1 %v379_v39 }
  0xc7   : > { %1270 = vmatprep.mubr.msk.f32.mxu1 %vm413_vm2, %v382_v60 }
  0xca   : > { %500 = vmatmul.mubr.f32.gmra.mrb[2].mxu1 %v381_v61 }
  0xcb   : > { %1271 = vmatprep.mubr.msk.f32.mxu1 %vm413_vm2, %v384_v23 }
  0xce   : > { %505 = vmatmul.mubr.f32.gmra.mrb[4].mxu1 %v383_v24 }
 0x17d   : > { %v596_v40 = vpop.f32.mrb[0].mxu0 }
 0x17e   : > { %v1332_v41 = vpop.f32.mrb[1].mxu0 }
 0x199   : > { %v496_v43 = vpop.f32.mrb[0].mxu1 }
 0x19a   : > { %v497_v44 = vadd.f32 %v2133_v42, %v496_v43  ;;  %v498_v45 = vpop.f32.mrb[1].mxu1  ;;  %v386_v43 = vld [vmem:[%s2083_s25 + $0x38] sm:$0xff] }
 0x19b   : > { %1272 = vmatprep.mubr.msk.f32.mxu1 %vm413_vm2, %v386_v43 }
 0x19c   : > { %v600_v46 = vadd.f32 %v596_v40, %v497_v44  ;;  %v385_v44 = vld [vmem:[%s2083_s25 + $0x30] sm:$0xff] }
 0x19d   : > { %v501_v1 = vpop.f32.mrb[2].mxu1  ;;  %510 = vmatmul.mubr.f32.gmra.mrb[6].mxu1 %v385_v44  ;;  %v1055_v44 = vlaneseq (!%p1285_p6) }
 0x19e   : > { %v1274_v47 = vmul.f32 -1.442695, %v600_v46  ;;  %v503_v2 = vpop.f32.mrb[3].mxu1  ;;  %v502_v5 = vadd.f32 %v2133_v42, %v501_v1 }
 0x1a0   : > { %1559 = vpow2.f32 %v1274_v47 }
 0x1a1   : > { %v506_v28 = vpop.f32.mrb[4].mxu1 }
 0x1a2   : > { %v508_v29 = vpop.f32.mrb[5].mxu1  ;;  %v507_v31 = vadd.f32 %v2133_v42, %v506_v28 }
 0x1a3   : > { %v1046_v29 = vld [vmem:[#allocation13 + $0x48] sm:$0xff] (!%p1285_p6) }
 0x1aa   : > { %v1560_v48 = vpop.eup %1559 }
 0x1ab   : > { %v604_v49 = vadd.f32 1.0, %v1560_v48 }
 0x1ad   : > { %1561 = vrcp.f32 %v604_v49 }
 0x1b7   : > { %v1562_v50 = vpop.eup %1561 }
 0x1b8   : > { %v607_v51 = vmul.f32 2.0, %v1562_v50 }
 0x1ba   : > { %v1275_v52 = vadd.f32 -1.0, %v607_v51 }
 0x1bc   : > { %615 = vrot.lane.b32.xlu0 %v1275_v52, %s1820_s12 }
 0x1c0   : > { %610 = vrot.lane.b32.xlu0 %v524_v53, %s1821_s24 }
 0x22e   : > { %v616_v54 = vpop.permute.xlu0 %615 }
 0x22f   : > { %v618_v55 = vmul.f32 %v1562_v50, %v616_v54 }
 0x231   : > { %620 = vrot.lane.b32.xlu1 %v618_v55, %s1821_s24 }
 0x232   : > { %v611_v56 = vpop.permute.xlu0 %610 }
 0x233   : > { %v613_v57 = vmul.f32 %v1562_v50, %v611_v56 }
 0x270   : > { %v511_v48 = vpop.f32.mrb[6].mxu1 }
 0x271   : > { %v513_v49 = vpop.f32.mrb[7].mxu1  ;;  %v512_v51 = vadd.f32 %v2133_v42, %v511_v48 }
 0x2a3   : > { %v621_v58 = vpop.permute.xlu1 %620 }
 0x2a4   : > { %v623_v59 = vadd.f32 %v621_v58, %v613_v57 }
 0x2a6   : > { %1563 = vtanh.f32 %v623_v59 }
 0x2b0   : > { %v1564_v62 = vpop.eup %1563 }
 0x2b1   : > { %626 = vrot.lane.b32.xlu1 %v1564_v62, %s1820_s12 }
 0x323   : > { %v627_v63 = vpop.permute.xlu1 %626 }
 0x324   : > { %v629_v0 = vmul.f32 %v1562_v50, %v627_v63 }
 0x326   : > { %633 = vrot.lane.b32.xlu0 %v629_v0, %s1821_s24 }
 0x398   : > { %v634_v3 = vpop.permute.xlu0 %633 }
 0x399   : > { %1342 = vmatmul.mubr.msk.f32.vlgmr.msra.gmra.mrb[2].mxu0 %vm526_vm3, %v634_v3 }
 0x39a   : > { %1418 = vmatpush3.bf16.msra.mxu0 %v2104_v13  ;;  %1352 = vmatprep.mubr.msk.f32.mxu0 %vm1818_vm1, %v1819_v7 }
 0x39b   : > { %1419 = vmatprep.subr.bf16.mxu0 %v1817_v4 }
 0x39e   : > { %1421 = vmatpush3.bf16.msra.mxu0 %v2109_v20 }
 0x39f   : > { %1422 = vmatprep.subr.bf16.mxu0 %v1817_v4 }
 0x46c   : > { %v703_v6 = vpop.f32.mrb[2].mxu0 }
 0x46d   : > { %v707_v8 = vadd.f32 %v703_v6, %v502_v5  ;;  %v1343_v9 = vpop.f32.mrb[3].mxu0 }
 0x46e   : > { %v954_v9 = vld [vmem:[#allocation11 + $0x8] sm:$0xff] (!%p1285_p6) }
 0x46f   : > { %v1277_v10 = vmul.f32 -1.442695, %v707_v8  ;;  %v953_v8 = vld [vmem:[#allocation11] sm:$0xff] (!%p1285_p6) }
 0x471   : > { %1565 = vpow2.f32 %v1277_v10  ;;  %v955_v10 = vld [vmem:[#allocation11 + $0x10] sm:$0xff] (!%p1285_p6) }
 0x47b   : > { %v1566_v11 = vpop.eup %1565 }
 0x47c   : > { %v711_v12 = vadd.f32 1.0, %v1566_v11  ;;  %v1823_v11 = vmov (!%p1285_p6), 0.0|0.0  }
 0x47e   : > { %1567 = vrcp.f32 %v711_v12  ;;  %v1429_v12 = vpack.c.bf16 (!%p1285_p6), %v954_v9, %v953_v8 }
 0x488   : > { %v1568_v14 = vpop.eup %1567 }
 0x489   : > { %v714_v15 = vmul.f32 2.0, %v1568_v14  ;;  %v716_v19 = vmul.f32 %v1568_v14, %v623_v59 }
 0x48b   : > { %v1278_v16 = vadd.f32 -1.0, %v714_v15  ;;  %v1825_v15 = vmov (!%p1285_p6), 0.0  }
 0x48c   : > { %1133 = vmatprep.mubr.f32.mxu1 (!%p1285_p6), %v1825_v15 }
 0x48d   : > { %718 = vrot.lane.b32.xlu1 %v1278_v16, %s1820_s12  ;;  %v1038_v16 = vld [vmem:[#allocation13 + $0x8] sm:$0xff] (!%p1285_p6) }
 0x4ff   : > { %v719_v17 = vpop.permute.xlu1 %718 }
 0x500   : > { %v721_v18 = vmul.f32 %v1568_v14, %v719_v17  ;;  %v1040_v17 = vld [vmem:[#allocation13 + $0x18] sm:$0xff] (!%p1285_p6) }
 0x502   : > { %723 = vrot.lane.b32.xlu0 %v721_v18, %s1821_s24  ;;  %v1434_v18 = vpack.c.bf16 (!%p1285_p6), %v1040_v17, %v1038_v16 }
 0x504   : > { %1435 = vmatprep.subr.bf16.mxu1 (!%p1285_p6), %v1434_v18 }
 0x574   : > { %v724_v21 = vpop.permute.xlu0 %723 }
 0x575   : > { %v726_v22 = vadd.f32 %v724_v21, %v716_v19  ;;  %v1037_v19 = vld [vmem:[#allocation13] sm:$0xff] (!%p1285_p6)  ;;  %v1039_v21 = vld [vmem:[#allocation13 + $0x10] sm:$0xff] (!%p1285_p6) }
 0x576   : > { %v1436_v24 = vpack.c.bf16 (!%p1285_p6), %v1039_v21, %v1037_v19 }
 0x577   : > { %1569 = vtanh.f32 %v726_v22 }
 0x578   : > { %1437 = vmatpush1.bf16.msra.mxu1 (!%p1285_p6), %v1436_v24 }
 0x581   : > { %v1570_v25 = vpop.eup %1569 }
 0x582   : > { %729 = vrot.lane.b32.xlu1 %v1570_v25, %s1820_s12  ;;  %v1044_v25 = vld [vmem:[#allocation13 + $0x38] sm:$0xff] (!%p1285_p6) }
 0x5f4   : > { %v730_v26 = vpop.permute.xlu1 %729 }
 0x5f5   : > { %v732_v27 = vmul.f32 %v1568_v14, %v730_v26  ;;  %v956_v14 = vld [vmem:[#allocation11 + $0x18] sm:$0xff] (!%p1285_p6)  ;;  %v1041_v26 = vld [vmem:[#allocation13 + $0x20] sm:$0xff] (!%p1285_p6) }
 0x5f6   : > { %v1432_v23 = vpack.c.bf16 (!%p1285_p6), %v956_v14, %v955_v10 }
 0x5f7   : > { %736 = vrot.lane.b32.xlu0 %v732_v27, %s1821_s24  ;;  %v1043_v27 = vld [vmem:[#allocation13 + $0x30] sm:$0xff] (!%p1285_p6) }
 0x669   : > { %v737_v30 = vpop.permute.xlu0 %736 }
 0x66a   : > { %1353 = vmatmul.mubr.msk.f32.vlgmr.msra.gmra.mrb[4].mxu0 %vm526_vm3, %v737_v30  ;;  %v1048_v30 = vld [vmem:[#allocation13 + $0x58] sm:$0xff] (!%p1285_p6) }
 0x66b   : > { %1424 = vmatpush3.bf16.msra.mxu0 %v2104_v13  ;;  %1363 = vmatprep.mubr.msk.f32.mxu0 %vm1818_vm1, %v1819_v7 }
 0x66c   : > { %1425 = vmatprep.subr.bf16.mxu0 %v1817_v4 }
 0x66f   : > { %1427 = vmatpush3.bf16.msra.mxu0 %v2109_v20 }
 0x670   : > { %1428 = vmatprep.subr.bf16.mxu0 (!%p1285_p6), %v1823_v11 }
 0x73d   : > { %v806_v32 = vpop.f32.mrb[4].mxu0 }
 0x73e   : > { %v810_v33 = vadd.f32 %v806_v32, %v507_v31  ;;  %v1354_v34 = vpop.f32.mrb[5].mxu0  ;;  %v1440_v31 = vpack.c.bf16 (!%p1285_p6), %v1043_v27, %v1041_v26  ;;  %v1442_v32 = vpack.c.bf16 (!%p1285_p6), %v1048_v30, %v1046_v29 }
 0x73f   : > { %v1047_v34 = vld [vmem:[#allocation13 + $0x50] sm:$0xff] (!%p1285_p6) }
 0x740   : > { %v1280_v35 = vmul.f32 -1.442695, %v810_v33  ;;  %v1045_v33 = vld [vmem:[#allocation13 + $0x40] sm:$0xff] (!%p1285_p6) }
 0x742   : > { %1571 = vpow2.f32 %v1280_v35  ;;  %v1444_v35 = vpack.c.bf16 (!%p1285_p6), %v1047_v34, %v1045_v33 }
 0x74c   : > { %v1572_v36 = vpop.eup %1571 }
 0x74d   : > { %v814_v37 = vadd.f32 1.0, %v1572_v36  ;;  %v1050_v36 = vld [vmem:[#allocation13 + $0x68] sm:$0xff] (!%p1285_p6) }
 0x74f   : > { %1573 = vrcp.f32 %v814_v37  ;;  %v1052_v37 = vld [vmem:[#allocation13 + $0x78] sm:$0xff] (!%p1285_p6) }
 0x759   : > { %v1574_v13 = vpop.eup %1573 }
 0x75a   : > { %v817_v38 = vmul.f32 2.0, %v1574_v13  ;;  %v819_v20 = vmul.f32 %v1574_v13, %v726_v22  ;;  %v1042_v22 = vld [vmem:[#allocation13 + $0x28] sm:$0xff] (!%p1285_p6) }
 0x75b   : > { %v1438_v28 = vpack.c.bf16 (!%p1285_p6), %v1044_v25, %v1042_v22 }
 0x75c   : > { %v1281_v39 = vadd.f32 -1.0, %v817_v38  ;;  %v1049_v38 = vld [vmem:[#allocation13 + $0x60] sm:$0xff] (!%p1285_p6) }
 0x75d   : > { %1439 = vmatprep.subr.bf16.mxu1 (!%p1285_p6), %v1438_v28 }
 0x75e   : > { %821 = vrot.lane.b32.xlu1 %v1281_v39, %s1820_s12  ;;  %1441 = vmatpush1.bf16.msra.mxu1 (!%p1285_p6), %v1440_v31  ;;  %v1051_v39 = vld [vmem:[#allocation13 + $0x70] sm:$0xff] (!%p1285_p6) }
 0x75f   : > { %1443 = vmatprep.subr.bf16.mxu1 (!%p1285_p6), %v1442_v32 }
 0x762   : > { %1445 = vmatpush1.bf16.msra.mxu1 (!%p1285_p6), %v1444_v35 }
 0x7d0   : > { %v822_v4 = vpop.permute.xlu1 %821 }
 0x7d1   : > { %v824_v7 = vmul.f32 %v1574_v13, %v822_v4  ;;  %v1448_v4 = vpack.c.bf16 (!%p1285_p6), %v1051_v39, %v1049_v38 }
 0x7d3   : > { %826 = vrot.lane.b32.xlu0 %v824_v7, %s1821_s24  ;;  %v1286_v7 = vld [vmem:[%s2230_s5] ss:$0 sm:$0xff] (!%p1285_p6) }
 0x845   : > { %v827_v40 = vpop.permute.xlu0 %826 }
 0x846   : > { %v829_v41 = vadd.f32 %v827_v40, %v819_v20 }
 0x848   : > { %1575 = vtanh.f32 %v829_v41 }
 0x852   : > { %v1576_v45 = vpop.eup %1575 }
 0x853   : > { %832 = vrot.lane.b32.xlu1 %v1576_v45, %s1820_s12  ;;  %v1056_v45 = vshrl.u32 (!%p1285_p6), %v1055_v44, 7 }
 0x855   : > { %v1061_v48 = vsub.s32 (!%p1285_p6), 1, %v1056_v45 }
 0x8c5   : > { %v833_v46 = vpop.permute.xlu1 %832 }
 0x8c6   : > { %v835_v47 = vmul.f32 %v1574_v13, %v833_v46  ;;  %v1446_v13 = vpack.c.bf16 (!%p1285_p6), %v1052_v37, %v1050_v36  ;;  %v1057_v46 = vsub.s32 (!%p1285_p6), 0, %v1056_v45 }
 0x8c8   : > { %839 = vrot.lane.b32.xlu0 %v835_v47, %s1821_s24  ;;  %1447 = vmatprep.subr.bf16.mxu1 (!%p1285_p6), %v1446_v13  ;;  %v1053_v47 = vld [vmem:[%s2232_s7] sm:$0x3] (!%p1285_p6) }
 0x8c9   : > { %1449 = vmatpush1.bf16.msra.mxu1 (!%p1285_p6), %v1448_v4  ;;  %v1058_v49 = vrot.slane (!%p1285_p6), %v1053_v47, %v1057_v46 }
 0x93a   : > { %v840_v50 = vpop.permute.xlu0 %839 }
 0x93b   : > { %1364 = vmatmul.mubr.msk.f32.vlgmr.msra.gmra.mrb[6].mxu0 %vm526_vm3, %v840_v50  ;;  %v1062_v50 = vrot.slane (!%p1285_p6), %v1053_v47, %v1061_v48 }
 0x93c   : > { %1374 = vmatprep.mubr.msk.f32.mxu0 (!%p1285_p6), %vm1824_vm5, %v1825_v15  ;;  %1430 = vmatpush3.bf16.msra.mxu0 (!%p1285_p6), %v1429_v12 }
 0x93d   : > { %1431 = vmatprep.subr.bf16.mxu0 (!%p1285_p6), %v1823_v11 }
 0x940   : > { %1433 = vmatpush3.bf16.msra.mxu0 (!%p1285_p6), %v1432_v23 }
 0xa0e   : > { %v909_v52 = vpop.f32.mrb[6].mxu0 }
 0xa0f   : > { %v913_v53 = vadd.f32 %v909_v52, %v512_v51  ;;  %v1365_v54 = vpop.f32.mrb[7].mxu0 }
 0xa11   : > { %v1283_v55 = vmul.f32 -1.442695, %v913_v53 }
 0xa13   : > { %1577 = vpow2.f32 %v1283_v55 }
 0xa1d   : > { %v1578_v56 = vpop.eup %1577 }
 0xa1e   : > { %v917_v57 = vadd.f32 1.0, %v1578_v56 }
 0xa20   : > { %1579 = vrcp.f32 %v917_v57 }
 0xa2a   : > { %v1580_v58 = vpop.eup %1579 }
 0xa2b   : > { %v920_v59 = vmul.f32 2.0, %v1580_v58  ;;  %v922_v63 = vmul.f32 %v1580_v58, %v829_v41 }
 0xa2d   : > { %v1284_v60 = vadd.f32 -1.0, %v920_v59 }
 0xa2f   : > { %924 = vrot.lane.b32.xlu1 %v1284_v60, %s1820_s12 }
 0xaa1   : > { %v925_v61 = vpop.permute.xlu1 %924 }
 0xaa2   : > { %v927_v62 = vmul.f32 %v1580_v58, %v925_v61 }
 0xaa4   : > { %929 = vrot.lane.b32.xlu0 %v927_v62, %s1821_s24 }
 0xb16   : > { %v930_v0 = vpop.permute.xlu0 %929 }
 0xb17   : > { %v932_v42 = vadd.f32 %v930_v0, %v922_v63 }
 0xb19   : > { %1581 = vtanh.f32 %v932_v42 }
 0xb23   : > { %v1582_v1 = vpop.eup %1581 }
 0xb24   : > { %935 = vrot.lane.b32.xlu1 %v1582_v1, %s1820_s12 }
 0xb28   : > { %945 = vrot.lane.b32.xlu1 %v932_v42, %s1822_s13 }
 0xb96   : > { %v936_v2 = vpop.permute.xlu1 %935 }
 0xb97   : > { %v938_v3 = vmul.f32 %v1580_v58, %v936_v2 }
 0xb99   : > { %940 = vrot.lane.b32.xlu0 %v938_v3, %s1821_s24 }
 0xb9a   : > { %v946_v5 = vpop.permute.xlu1 %945 }
 0xb9b   : > { %948 = vst.msk [vmem:[#allocation4] sm:$0xff] %vm526_vm3, %v946_v5 }
 0xc06   : > { %952 = sbr.rel (%p1285_p6) target bundleno = 3542 (0xdd6), region = 80 }
 0xc0b   : > { %v941_v6 = vpop.permute.xlu0 %940 }
 0xc0c   : > { %943 = vst.msk [vmem:[#allocation3] sm:$0xff] %vm526_vm3, %v941_v6  ;;  %1375 = vmatmul.mubr.msk.f32.vlgmr.msra.gmra.mrb[0].mxu0 (!%p1285_p6), %vm526_vm3, %v941_v6 }
 0xcdf   : > { %v1032_v20 = vpop.f32.mrb[0].mxu0 }
 0xce0   : > { %v1033_v40 = vadd.f32 %v1286_v7, %v1032_v20  ;;  %v1376_v41 = vpop.f32.mrb[1].mxu0 }
 0xce2   : > { %v1036_v43 = vmax.f32 %v1033_v40, 0.0 }
 0xce4   : > { %1288 = vmatmul.mubr.msk.f32.vlgmr.msra.gmra.mrb[0].mxu1 %vm1065_vm6, %v1036_v43 }
 0xdb7   : > { %v1135_v51 = vpop.f32.mrb[0].mxu1 }
 0xdb8   : > { %v1136_v52 = vadd.f32 %v1135_v51, %v1058_v49  ;;  %v1137_v53 = vpop.f32.mrb[1].mxu1 }
 0xdb9   : > { %v1138_v54 = vadd.f32 %v1137_v53, %v1062_v50 }
 0xdba   : > { %v1289_v55 = vmul.f32 -1.442695, %v1136_v52 }
 0xdbb   : > { %v1290_v56 = vmul.f32 -1.442695, %v1138_v54 }
 0xdbc   : > { %1583 = vpow2.f32 %v1289_v55 }
 0xdbd   : > { %1585 = vpow2.f32 %v1290_v56 }
 0xdc6   : > { %v1584_v57 = vpop.eup %1583 }
 0xdc7   : > { %v1586_v58 = vpop.eup %1585  ;;  %v1146_v59 = vadd.f32 1.0, %v1584_v57 }
 0xdc8   : > { %v1147_v60 = vadd.f32 1.0, %v1586_v58 }
 0xdc9   : > { %1587 = vrcp.f32 %v1146_v59 }
 0xdca   : > { %1589 = vrcp.f32 %v1147_v60 }
 0xdd3   : > { %v1588_v61 = vpop.eup %1587 }
 0xdd4   : > { %v1590_v62 = vpop.eup %1589  ;;  %1152 = vst [vmem:[#allocation14] sm:$0xff] %v1588_v61 }
 0xdd5   : > { %1153 = vst [vmem:[#allocation14 + $0x8] sm:$0xff] %v1590_v62 }
 0xdd6 PF: > { %p1506_p12 = scmp.eq.s32.totalorder %s1891_s9, 1  ;;  %s1826_s14 = smov [#allocation14]  }
 0xdd7   : > { %s1161_s27 = sshll.u32 %s1826_s14, 4  ;;  %s1162_s27 = int_to_ptr.vmem [resolvable:$true] %s1161_s27 }
 0xdd8   : > { %s1733_s20 = scalar_lea.vmem %s1162_s27, 256  ;;  %p1740_p9 = scmp.lt.s32.totalorder %s1162_s27, %s1162_s27 }
 0xdd9   : > { %p1734_p13 = scmp.ne.s32.totalorder %s1162_s27, %s1733_s20  ;;  %p1741_p11 = scmp.lt.s32.totalorder %s1733_s20, %s1733_s20 }
 0xddb   : > { %p1735_p0 = pnand %p1734_p13, %p1506_p12  ;;  %p1742_p2 = por %p1741_p11, %p1740_p9 }
 0xddd   : > { %p1736_p3 = pneg %p1735_p0 }
 0xddf   : > { %p1743_p7 = pnand %p1742_p2, %p1736_p3 }
 0xde1   : > { %1746 = shalt.err (!%p1743_p7)
}
 0xde2   : > { %s1747_s21 = scalar_lea.hbm %s2233_s8, 256 }
 0xde3   : > { %p1748_p1 = scmp.ne.s32.totalorder %s2233_s8, %s1747_s21  ;;  %p1753_p10 = scmp.lt.u32.totalorder %s1747_s21, %s2233_s8 }
 0xde5   : > { %p1749_p8 = pnand %p1748_p1, %p1506_p12 }
 0xde7   : > { %p1750_p4 = pneg %p1749_p8 }
 0xde9   : > { %p1755_p5 = pnand %p1753_p10, %p1750_p4 }
 0xdeb   : > { %1758 = shalt.err (!%p1755_p5)
}
 0xdec   : > { %1477 = dma.vmem_to_hbm [thread:$0]  (%p1506_p12), %s1162_s27, 256, %s2233_s8, [#allocation7]  }
 0xded   : > { %1788 = dma.done.wait (%p1506_p12), [#allocation7], 256  }
 0xdee   : > { %1790 = vsyncadd (%p1506_p12), [#allocation7], 4294967040 }
 0xdef PF: > { %p21_p6 = scmp.ge.s32.totalorder %s2024_s17, 4   ;;  %s2249_s27 = smov %s1797_s28 }
 0xdf0   : > { %s2250_s28 = smov %s1801_s29  ;;  %s2251_s29 = smov %s2033_s22 }
 0xdf1   : > { %s2252_s30 = smov %s2024_s17  ;;  %23 = sbr.rel (!%p21_p6) target bundleno = 6 (0x6), region = 116 }
 0xdf8   :  { %1174 = vsyncpa [#allocation6], 1 }
 0xdf9   :  { %1176 = vsyncpa [#allocation6 + $0x1], 1 }
 0xdfa   :  { %1177 = vsyncpa [#allocation9], 1 }
 0xdfb   :  { %1178 = vsyncpa [#allocation12], 1 }
 0xdfc   :  { %1179 = vsyncpa [#allocation7], 1 }
 0xdfd   :  { %1181 = vsyncpa [#allocation7 + $0x1], 1 }

</bundles_post_ra>
